<compile_context>
chip_gen: v7x
topology: tpu7x:2x2x1
jax: 0.10.0
libtpu: 0.0.40
codegen_flags: <defaults>
</compile_context>

<pallas_src>
import numpy as np
import jax
import jax.numpy as jnp
from jax.experimental import pallas as pl
from jax.experimental.pallas import tpu as pltpu

# ---------------- model hyper-parameters (small, consistent with the module) ----
IN_DIM = 4            # dimension of x
Z_DIM = 16            # encoder output dim
ENC_SHAPES = [32, 32]
DEC_SHAPES = [32, 32]
T_CHANNEL = 10        # PositionalEncoding(10) -> 20 features
BATCH = 8

# ---------------- packed-slab / frame layout -------------------------------------
LANES = 128
PE_DIM = 2 * T_CHANNEL             # 20 interleaved sin/cos features
PE_LANE0 = 8                       # posenc occupies frame lanes [8:28]
TX_LANES = 8                       # merged input operand: lanes 0:4 = x, lane 4 = t
N_LAYERS = 6                       # 3 fused-encoder layers + 3 decoder layers
BIAS_BASE = N_LAYERS * LANES       # sublane offset of the bias/freq/mask block (768)
FREQ_ROW = BIAS_BASE + N_LAYERS    # row 774: exact 2**(j//2) on PE lanes, 0 elsewhere
SIN_ROW = FREQ_ROW + 1             # row 775: 1.0 on even PE lanes
COS_ROW = FREQ_ROW + 2             # row 776: 1.0 on odd PE lanes
SLAB_ROWS = BIAS_BASE + 16         # tail padded to two full 8-sublane tiles (784)

# Activation-frame lane layout (all frames are 128 lanes wide, zero-padded):
#   h0 : [0:4] = x, [4] = t (ignored, layer-0 weight row is zero), [8:28] = posenc(t)
#   h1 : [0:32] = x-branch hid1, [32:64] = t-branch hid1
#   h2 : [0:32] = x-branch hid2, [32:64] = t-branch hid2
#   h3 : [0:16] = z,            [16:32] = t_emb        (== torch.cat([z, t_emb]))
#   h4,h5 : decoder hiddens in lanes [0:32]; final output in lanes [0:4]


# ---------------- Pallas kernel: the full SimpleNet forward ---------------------
def simplenet_kernel(tx_ref, slab_ref, o_ref):
    bm = tx_ref.shape[0]
    x_t = tx_ref[...]                                    # (bm, 8): x | t | zeros
    t = x_t[:, IN_DIM:IN_DIM + 1]                        # (bm, 1)

    freq = slab_ref[FREQ_ROW:FREQ_ROW + 1, :]            # (1, 128) exact 2**(j//2)
    smask = slab_ref[SIN_ROW:SIN_ROW + 1, :]             # (1, 128) 0/1
    cmask = slab_ref[COS_ROW:COS_ROW + 1, :]             # (1, 128) 0/1

    # Interleaved positional encoding, zero outside PE lanes (masks are 0 there,
    # so sin(0)/cos(0) never leak). Exactly matches torch's sin/cos interleave.
    ang = t * freq                                       # (bm, 128)
    pe = jnp.sin(ang) * smask + jnp.cos(ang) * cmask

    # Fused 128-lane input frame built in vregs (no scratch, no masked stores).
    h = jnp.concatenate(
        [x_t, jnp.zeros((bm, LANES - TX_LANES), jnp.float32)], axis=-1) + pe

    # ---- 6 fused linear layers, each a single padded 128x128 MXU tile ----
    def layer(h, idx, relu):
        w = slab_ref[idx * LANES:(idx + 1) * LANES, :]             # (128, 128)
        b = slab_ref[BIAS_BASE + idx:BIAS_BASE + idx + 1, :]       # (1, 128)
        y = jnp.dot(h, w, preferred_element_type=jnp.float32) + b
        return jnp.maximum(y, 0.0) if relu else y

    h = layer(h, 0, True)    # block-diag: x-enc L1 | t-enc L1
    h = layer(h, 1, True)    # block-diag: x-enc L2 | t-enc L2
    h = layer(h, 2, True)    # block-diag -> [z | t_emb] (trailing encoder ReLUs)
    h = layer(h, 3, True)    # decoder L1 (acts on cat([z, t_emb]))
    h = layer(h, 4, True)    # decoder L2
    h = layer(h, 5, False)   # decoder output (no activation)

    o_ref[...] = h           # lane-dense (bm, 128) store; wrapper slices [:, :IN_DIM]


# ---------------- parameter init (deterministic, PyTorch nn.Linear style) -------
def _init_linear(key, in_dim, out_dim):
    """Returns W with PyTorch shape (out, in) and b with shape (out,)."""
    kw, kb = jax.random.split(key)
    bound = 1.0 / jnp.sqrt(jnp.float32(in_dim))
    w = jax.random.uniform(kw, (out_dim, in_dim), jnp.float32, -bound, bound)
    b = jax.random.uniform(kb, (out_dim,), jnp.float32, -bound, bound)
    return w, b


def _init_mlp(key, in_dim, out_dim, hid_shapes):
    shapes = [in_dim] + list(hid_shapes) + [out_dim]
    keys = jax.random.split(key, len(shapes) - 1)
    return [_init_linear(keys[i], shapes[i], shapes[i + 1])
            for i in range(len(shapes) - 1)]


def init_simplenet_params(key):
    k_t, k_x, k_d = jax.random.split(key, 3)
    return {
        "t_mlp": _init_mlp(k_t, 2 * T_CHANNEL, Z_DIM, ENC_SHAPES),
        "x_mlp": _init_mlp(k_x, IN_DIM, Z_DIM, ENC_SHAPES),
        "dec_mlp": _init_mlp(k_d, 2 * Z_DIM, IN_DIM, DEC_SHAPES),
    }


# ---------------- one-time parameter packing (NOT in the per-call hot path) -----
def prepare_params(params):
    """Pack all SimpleNet params into one lane-padded f32 slab. Run once, cache."""
    t_mlp = [(np.asarray(w, np.float32), np.asarray(b, np.float32)) for w, b in params["t_mlp"]]
    x_mlp = [(np.asarray(w, np.float32), np.asarray(b, np.float32)) for w, b in params["x_mlp"]]
    d_mlp = [(np.asarray(w, np.float32), np.asarray(b, np.float32)) for w, b in params["dec_mlp"]]

    H1, H2 = ENC_SHAPES
    slab = np.zeros((SLAB_ROWS, LANES), np.float32)

    def put_w(layer_idx, row0, col0, w_torch):           # w_torch: (out, in)
        wt = w_torch.T                                    # (in, out)
        r, c = wt.shape
        base = layer_idx * LANES
        slab[base + row0:base + row0 + r, col0:col0 + c] = wt

    def put_b(layer_idx, col0, b):
        slab[BIAS_BASE + layer_idx, col0:col0 + b.shape[0]] = b

    # fused encoder L1: frame lanes [0:4]=x, [PE_LANE0:PE_LANE0+20]=posenc(t)
    put_w(0, 0, 0, x_mlp[0][0]);            put_b(0, 0, x_mlp[0][1])
    put_w(0, PE_LANE0, H1, t_mlp[0][0]);    put_b(0, H1, t_mlp[0][1])
    # fused encoder L2: lanes [0:H1]=x branch, [H1:2H1]=t branch
    put_w(1, 0, 0, x_mlp[1][0]);            put_b(1, 0, x_mlp[1][1])
    put_w(1, H1, H2, t_mlp[1][0]);          put_b(1, H2, t_mlp[1][1])
    # fused encoder L3 -> output lanes [0:Z_DIM]=z, [Z_DIM:2Z_DIM]=t_emb
    put_w(2, 0, 0, x_mlp[2][0]);            put_b(2, 0, x_mlp[2][1])
    put_w(2, H2, Z_DIM, t_mlp[2][0]);       put_b(2, Z_DIM, t_mlp[2][1])
    # decoder (input lanes [0:2*Z_DIM] == cat([z, t_emb]))
    put_w(3, 0, 0, d_mlp[0][0]);            put_b(3, 0, d_mlp[0][1])
    put_w(4, 0, 0, d_mlp[1][0]);            put_b(4, 0, d_mlp[1][1])
    put_w(5, 0, 0, d_mlp[2][0]);            put_b(5, 0, d_mlp[2][1])

    # posenc rows: exact 2**i frequencies + interleaved 0/1 sin/cos masks
    pe_lanes = PE_LANE0 + np.arange(PE_DIM)
    slab[FREQ_ROW, pe_lanes] = 2.0 ** (np.arange(PE_DIM) // 2)
    slab[SIN_ROW, pe_lanes[0::2]] = 1.0
    slab[COS_ROW, pe_lanes[1::2]] = 1.0

    return jnp.asarray(slab)


# ---------------- batch tiling helpers -------------------------------------------
def _round_up(n, m):
    return ((n + m - 1) // m) * m


def _pick_bm(batch):
    # Aim for >=2 grid steps (engages v7x's second TensorCore via "parallel"),
    # cap blocks at 256 rows (feeds v6e/v7x's 256-wide MXU; per-step VMEM <2 MiB),
    # floor at 8 rows (sublane tile). Batch is padded up to a multiple of bm.
    half = _round_up(max(1, (batch + 1) // 2), 8)
    return max(8, min(256, half))


# ---------------- wrapper: thin jitted hot path (2 operands, 1 pallas_call) -----
@jax.jit
def simplenet_forward(t, x, slab):
    """t: (B,) or (B,1) f32 ; x: (B, IN_DIM) f32 ; slab: from prepare_params."""
    if t.ndim == 1:
        t = t[:, None]                                   # matches t.unsqueeze(-1)
    t = t.astype(jnp.float32)
    x = x.astype(jnp.float32)
    B = x.shape[0]

    # merged input operand: lanes 0:4 = x, lane 4 = t, lanes 5:8 = 0
    tx = jnp.concatenate(
        [x, t, jnp.zeros((B, TX_LANES - IN_DIM - 1), jnp.float32)], axis=-1)

    bm = _pick_bm(B)
    pad_b = _round_up(B, bm)
    if pad_b != B:
        tx = jnp.pad(tx, ((0, pad_b - B), (0, 0)))
    grid = (pad_b // bm,)

    grid_spec = pltpu.PrefetchScalarGridSpec(
        num_scalar_prefetch=0,
        grid=grid,
        in_specs=[
            pl.BlockSpec((bm, TX_LANES), lambda i: (i, 0)),
            pl.BlockSpec((SLAB_ROWS, LANES), lambda i: (0, 0)),
        ],
        out_specs=pl.BlockSpec((bm, LANES), lambda i: (i, 0)),
    )
    out = pl.pallas_call(
        simplenet_kernel,
        out_shape=jax.ShapeDtypeStruct((pad_b, LANES), jnp.float32),
        grid_spec=grid_spec,
        compiler_params=pltpu.CompilerParams(
            dimension_semantics=("parallel",)),
    )(tx, slab)
    return out[:B, :IN_DIM]                              # lane-dense store, slice outside


# ---------------- plain-JAX reference (faithful to the PyTorch module) ----------
def simplenet_reference(t, x, params):
    if t.ndim == 1:
        t = t[:, None]
    embs = []
    for i in range(T_CHANNEL):
        embs.append(jnp.sin((2.0 ** i) * t))
        embs.append(jnp.cos((2.0 ** i) * t))
    t_in = jnp.concatenate(embs, axis=-1)

    def mlp(h, layers):
        n = len(layers)
        for i, (w, b) in enumerate(layers):
            h = h @ w.T + b
            if i < n - 1:
                h = jnp.maximum(h, 0.0)
        return h

    t_emb = jnp.maximum(mlp(t_in, params["t_mlp"]), 0.0)
    z = jnp.maximum(mlp(x, params["x_mlp"]), 0.0)
    z = jnp.concatenate([z, t_emb], axis=-1)
    return mlp(z, params["dec_mlp"])


if __name__ == "__main__":
    key = jax.random.PRNGKey(0)
    k_params, k_t, k_x = jax.random.split(key, 3)

    params = init_simplenet_params(k_params)
    slab = prepare_params(params)                                # one-time packing
    t = jax.random.uniform(k_t, (BATCH,), jnp.float32)           # diffusion time
    x = jax.random.normal(k_x, (BATCH, IN_DIM), jnp.float32)     # noisy data

    out = jax.block_until_ready(simplenet_forward(t, x, slab))

    ref = simplenet_reference(t, x, params)
    assert out.shape == (BATCH, IN_DIM)
    err = jnp.max(jnp.abs(out - ref))
    assert jnp.allclose(out, ref, atol=1e-5, rtol=1e-5), f"mismatch vs reference (max abs err {err})"

    print("KERNEL_OK")
</pallas_src>

<mosaic_0001>
module attributes {stable_mosaic.version = 11 : i64} {
  func.func @simplenet_kernel(%arg0: i32, %arg1: memref<8x8xf32, #tpu.memory_space<vmem>>, %arg2: memref<784x128xf32, #tpu.memory_space<vmem>>, %arg3: memref<8x128xf32, #tpu.memory_space<vmem>>) attributes {dimension_semantics = [#tpu.dimension_semantics<parallel>], iteration_bounds = array<i64: 1>, scalar_prefetch = 0 : i64, scratch_operands = 0 : i64, tpu.core_type = #tpu.core_type<tc>, window_params = [{transform_indices = @transform_0, window_bounds = array<i64: 8, 8>}, {pipeline_mode = #tpu.pipeline_mode<synchronous>, transform_indices = @transform_1, window_bounds = array<i64: 784, 128>}, {transform_indices = @transform_2, window_bounds = array<i64: 8, 128>}]} {
    %c0 = arith.constant 0 : index
    %c0_0 = arith.constant 0 : index
    %0 = vector.load %arg1[%c0, %c0_0] : memref<8x8xf32, #tpu.memory_space<vmem>>, vector<8x8xf32>
    %1 = vector.extract_strided_slice %0 {offsets = [0, 4], sizes = [8, 1], strides = [1, 1]} : vector<8x8xf32> to vector<8x1xf32>
    %c774 = arith.constant 774 : index
    %c0_1 = arith.constant 0 : index
    %2 = vector.load %arg2[%c774, %c0_1] : memref<784x128xf32, #tpu.memory_space<vmem>>, vector<1x128xf32>
    %c775 = arith.constant 775 : index
    %c0_2 = arith.constant 0 : index
    %3 = vector.load %arg2[%c775, %c0_2] : memref<784x128xf32, #tpu.memory_space<vmem>>, vector<1x128xf32>
    %c776 = arith.constant 776 : index
    %c0_3 = arith.constant 0 : index
    %4 = vector.load %arg2[%c776, %c0_3] : memref<784x128xf32, #tpu.memory_space<vmem>>, vector<1x128xf32>
    %5 = vector.broadcast %1 : vector<8x1xf32> to vector<8x128xf32>
    %6 = vector.broadcast %2 : vector<1x128xf32> to vector<8x128xf32>
    %7 = arith.mulf %5, %6 : vector<8x128xf32>
    %8 = math.sin %7 : vector<8x128xf32>
    %9 = vector.broadcast %3 : vector<1x128xf32> to vector<8x128xf32>
    %10 = arith.mulf %8, %9 : vector<8x128xf32>
    %11 = math.cos %7 : vector<8x128xf32>
    %12 = vector.broadcast %4 : vector<1x128xf32> to vector<8x128xf32>
    %13 = arith.mulf %11, %12 : vector<8x128xf32>
    %14 = arith.addf %10, %13 : vector<8x128xf32>
    %cst = arith.constant 0.000000e+00 : f32
    %15 = vector.broadcast %cst : f32 to vector<8x120xf32>
    %16 = tpu.concatenate %0, %15 in 1 : vector<8x8xf32>, vector<8x120xf32> -> vector<8x128xf32>
    %17 = arith.addf %16, %14 : vector<8x128xf32>
    %c0_4 = arith.constant 0 : index
    %c0_5 = arith.constant 0 : index
    %18 = vector.load %arg2[%c0_4, %c0_5] : memref<784x128xf32, #tpu.memory_space<vmem>>, vector<128x128xf32>
    %c768 = arith.constant 768 : index
    %c0_6 = arith.constant 0 : index
    %19 = vector.load %arg2[%c768, %c0_6] : memref<784x128xf32, #tpu.memory_space<vmem>>, vector<1x128xf32>
    %cst_7 = arith.constant dense<0.000000e+00> : vector<8x128xf32>
    %20 = tpu.matmul %17, %18, %cst_7 {dimension_numbers = #tpu.dot_dimension_numbers<[1], [0], [0], [1], [0, 0, 1, 1], [], []>} : vector<8x128xf32>, vector<128x128xf32>, vector<8x128xf32> -> vector<8x128xf32>
    %21 = vector.broadcast %19 : vector<1x128xf32> to vector<8x128xf32>
    %22 = arith.addf %20, %21 : vector<8x128xf32>
    %cst_8 = arith.constant 0.000000e+00 : f32
    %23 = vector.broadcast %cst_8 : f32 to vector<8x128xf32>
    %24 = arith.maximumf %22, %23 : vector<8x128xf32>
    %c128 = arith.constant 128 : index
    %c0_9 = arith.constant 0 : index
    %25 = vector.load %arg2[%c128, %c0_9] : memref<784x128xf32, #tpu.memory_space<vmem>>, vector<128x128xf32>
    %c769 = arith.constant 769 : index
    %c0_10 = arith.constant 0 : index
    %26 = vector.load %arg2[%c769, %c0_10] : memref<784x128xf32, #tpu.memory_space<vmem>>, vector<1x128xf32>
    %cst_11 = arith.constant dense<0.000000e+00> : vector<8x128xf32>
    %27 = tpu.matmul %24, %25, %cst_11 {dimension_numbers = #tpu.dot_dimension_numbers<[1], [0], [0], [1], [0, 0, 1, 1], [], []>} : vector<8x128xf32>, vector<128x128xf32>, vector<8x128xf32> -> vector<8x128xf32>
    %28 = vector.broadcast %26 : vector<1x128xf32> to vector<8x128xf32>
    %29 = arith.addf %27, %28 : vector<8x128xf32>
    %cst_12 = arith.constant 0.000000e+00 : f32
    %30 = vector.broadcast %cst_12 : f32 to vector<8x128xf32>
    %31 = arith.maximumf %29, %30 : vector<8x128xf32>
    %c256 = arith.constant 256 : index
    %c0_13 = arith.constant 0 : index
    %32 = vector.load %arg2[%c256, %c0_13] : memref<784x128xf32, #tpu.memory_space<vmem>>, vector<128x128xf32>
    %c770 = arith.constant 770 : index
    %c0_14 = arith.constant 0 : index
    %33 = vector.load %arg2[%c770, %c0_14] : memref<784x128xf32, #tpu.memory_space<vmem>>, vector<1x128xf32>
    %cst_15 = arith.constant dense<0.000000e+00> : vector<8x128xf32>
    %34 = tpu.matmul %31, %32, %cst_15 {dimension_numbers = #tpu.dot_dimension_numbers<[1], [0], [0], [1], [0, 0, 1, 1], [], []>} : vector<8x128xf32>, vector<128x128xf32>, vector<8x128xf32> -> vector<8x128xf32>
    %35 = vector.broadcast %33 : vector<1x128xf32> to vector<8x128xf32>
    %36 = arith.addf %34, %35 : vector<8x128xf32>
    %cst_16 = arith.constant 0.000000e+00 : f32
    %37 = vector.broadcast %cst_16 : f32 to vector<8x128xf32>
    %38 = arith.maximumf %36, %37 : vector<8x128xf32>
    %c384 = arith.constant 384 : index
    %c0_17 = arith.constant 0 : index
    %39 = vector.load %arg2[%c384, %c0_17] : memref<784x128xf32, #tpu.memory_space<vmem>>, vector<128x128xf32>
    %c771 = arith.constant 771 : index
    %c0_18 = arith.constant 0 : index
    %40 = vector.load %arg2[%c771, %c0_18] : memref<784x128xf32, #tpu.memory_space<vmem>>, vector<1x128xf32>
    %cst_19 = arith.constant dense<0.000000e+00> : vector<8x128xf32>
    %41 = tpu.matmul %38, %39, %cst_19 {dimension_numbers = #tpu.dot_dimension_numbers<[1], [0], [0], [1], [0, 0, 1, 1], [], []>} : vector<8x128xf32>, vector<128x128xf32>, vector<8x128xf32> -> vector<8x128xf32>
    %42 = vector.broadcast %40 : vector<1x128xf32> to vector<8x128xf32>
    %43 = arith.addf %41, %42 : vector<8x128xf32>
    %cst_20 = arith.constant 0.000000e+00 : f32
    %44 = vector.broadcast %cst_20 : f32 to vector<8x128xf32>
    %45 = arith.maximumf %43, %44 : vector<8x128xf32>
    %c512 = arith.constant 512 : index
    %c0_21 = arith.constant 0 : index
    %46 = vector.load %arg2[%c512, %c0_21] : memref<784x128xf32, #tpu.memory_space<vmem>>, vector<128x128xf32>
    %c772 = arith.constant 772 : index
    %c0_22 = arith.constant 0 : index
    %47 = vector.load %arg2[%c772, %c0_22] : memref<784x128xf32, #tpu.memory_space<vmem>>, vector<1x128xf32>
    %cst_23 = arith.constant dense<0.000000e+00> : vector<8x128xf32>
    %48 = tpu.matmul %45, %46, %cst_23 {dimension_numbers = #tpu.dot_dimension_numbers<[1], [0], [0], [1], [0, 0, 1, 1], [], []>} : vector<8x128xf32>, vector<128x128xf32>, vector<8x128xf32> -> vector<8x128xf32>
    %49 = vector.broadcast %47 : vector<1x128xf32> to vector<8x128xf32>
    %50 = arith.addf %48, %49 : vector<8x128xf32>
    %cst_24 = arith.constant 0.000000e+00 : f32
    %51 = vector.broadcast %cst_24 : f32 to vector<8x128xf32>
    %52 = arith.maximumf %50, %51 : vector<8x128xf32>
    %c640 = arith.constant 640 : index
    %c0_25 = arith.constant 0 : index
    %53 = vector.load %arg2[%c640, %c0_25] : memref<784x128xf32, #tpu.memory_space<vmem>>, vector<128x128xf32>
    %c773 = arith.constant 773 : index
    %c0_26 = arith.constant 0 : index
    %54 = vector.load %arg2[%c773, %c0_26] : memref<784x128xf32, #tpu.memory_space<vmem>>, vector<1x128xf32>
    %cst_27 = arith.constant dense<0.000000e+00> : vector<8x128xf32>
    %55 = tpu.matmul %52, %53, %cst_27 {dimension_numbers = #tpu.dot_dimension_numbers<[1], [0], [0], [1], [0, 0, 1, 1], [], []>} : vector<8x128xf32>, vector<128x128xf32>, vector<8x128xf32> -> vector<8x128xf32>
    %56 = vector.broadcast %54 : vector<1x128xf32> to vector<8x128xf32>
    %57 = arith.addf %55, %56 : vector<8x128xf32>
    %c0_28 = arith.constant 0 : index
    %c0_29 = arith.constant 0 : index
    %58 = vector.load %arg3[%c0_28, %c0_29] : memref<8x128xf32, #tpu.memory_space<vmem>>, vector<8x128xf32>
    tpu.vector_store %arg3[%c0_28, %c0_29], %57 {strides = array<i32>} : memref<8x128xf32, #tpu.memory_space<vmem>>, vector<8x128xf32>,
    return
  }
  func.func @transform_0(%arg0: i32) -> (i32, i32) {
    %c0_i32 = arith.constant 0 : i32
    %c0_i32_0 = arith.constant 0 : i32
    return %arg0, %c0_i32 : i32, i32
  }
  func.func @transform_1(%arg0: i32) -> (i32, i32) {
    %c0_i32 = arith.constant 0 : i32
    %c0_i32_0 = arith.constant 0 : i32
    %c0_i32_1 = arith.constant 0 : i32
    return %c0_i32, %c0_i32_0 : i32, i32
  }
  func.func @transform_2(%arg0: i32) -> (i32, i32) {
    %c0_i32 = arith.constant 0 : i32
    %c0_i32_0 = arith.constant 0 : i32
    return %arg0, %c0_i32 : i32, i32
  }
}

</mosaic_0001>

<bundles_post_ra>
// kernel: simplenet_forward.1
= control target key start
LH: loop header
LB: loop body
LE: loop exit
PB: predicated region body
PF: predicated region fallthrough
CT: control target
= control target key end

     0   :  { %7 = vsyncpa [#allocation3], 0  ;;  %s1336_s9 = smov [#allocation2]   ;;  %s1467_s0 = inlined_call_operand.vmem [shape: f32[8,8], index: 0, kind: input, shape index: {}]   ;;  %s1468_s1 = inlined_call_operand.hbm [shape: f32[784,128], index: 1, kind: input, shape index: {}]   ;;  %s1469_s2 = inlined_call_operand.vmem [shape: f32[8,128], index: 2, kind: output, shape index: {}]  }
   0x1   :  { %s15_s10 = sshll.u32 %s1336_s9, 4  ;;  %s1312_s13 = scalar_lea.hbm %s1468_s1, 12544  ;;  %s16_s10 = int_to_ptr.vmem [resolvable:$true] %s15_s10 }
   0x2   :  { %p1313_p0 = scmp.ne.s32.totalorder %s1468_s1, %s1312_s13  ;;  %p1316_p1 = scmp.lt.u32.totalorder %s1312_s13, %s1468_s1 }
   0x4   :  { %p1318_p2 = pnand %p1316_p1, %p1313_p0 }
   0x6   :  { %1321 = shalt.err (!%p1318_p2)
}
   0x7   :  { %s1322_s18 = scalar_lea.vmem %s16_s10, 12544  ;;  %p1327_p4 = scmp.lt.s32.totalorder %s16_s10, %s16_s10 }
   0x8   :  { %p1323_p3 = scmp.ne.s32.totalorder %s16_s10, %s1322_s18  ;;  %p1328_p5 = scmp.lt.s32.totalorder %s1322_s18, %s1322_s18 }
   0xa   :  { %p1329_p6 = por %p1328_p5, %p1327_p4 }
   0xc   :  { %p1330_p7 = pnand %p1329_p6, %p1323_p3 }
   0xe   :  { %1333 = shalt.err (!%p1330_p7)
}
   0xf   :  { %s1337_s19 = smov 128   ;;  %s1338_s20 = smov 8  }
  0x10   :  { %21 = dma.hbm_to_vmem [thread:$0]  %s1468_s1, 12544, %s16_s10, [#allocation3], %s1337_s19, %s1337_s19, %s1338_s20  }
  0x11   :  { %1334 = dma.done.wait [#allocation3], 12544  }
  0x12   :  { %1335 = vsyncadd [#allocation3], 4294954752  ;;  %v1339_v0 = vmov 4   ;;  %v1379_v1 = vld [vmem:[%s1467_s0] sm:$0xff]  ;;  %v261_v3 = vld [vmem:[#allocation2 + $0x8] sm:$0xff]  ;;  %v1340_v5 = vmov 0.0|0.0  }
  0x13   :  { %1307 = vset.pattern.permute.xlu0 %v1339_v0  ;;  %v260_v2 = vld [vmem:[#allocation2] sm:$0xff]  ;;  %1146 = vmatprep.subr.bf16.mxu0 %v1340_v5  ;;  %v262_v6 = vld [vmem:[#allocation2 + $0x10] sm:$0xff]  ;;  %v263_v7 = vld [vmem:[#allocation2 + $0x18] sm:$0xff]  ;;  %vm1341_vm0 = vmmov 0   ;;  %v1342_v17 = vmov 0.0  }
  0x14   :  { %31 = vperm.xlu0 %1307, %v1379_v1   ;;  %v1147_v4 = vpack.c.bf16 %v261_v3, %v260_v2  ;;  %1170 = vmatprep.subr.bf16.mxu1 %v1340_v5  ;;  %v1150_v8 = vpack.c.bf16 %v263_v7, %v262_v6  ;;  %v264_v9 = vld [vmem:[#allocation2 + $0x20] sm:$0xff]  ;;  %v265_v10 = vld [vmem:[#allocation2 + $0x28] sm:$0xff]  ;;  %v266_v12 = vld [vmem:[#allocation2 + $0x30] sm:$0xff]  ;;  %v1343_v62 = vmov 683565275  }
  0x15   :  { %v1153_v11 = vpack.c.bf16 %v265_v10, %v264_v9  ;;  %v267_v13 = vld [vmem:[#allocation2 + $0x38] sm:$0xff]  ;;  %v268_v15 = vld [vmem:[#allocation2 + $0x40] sm:$0xff]  ;;  %v269_v16 = vld [vmem:[#allocation2 + $0x48] sm:$0xff]  ;;  %968 = vmatprep.mubr.msk.f32.mxu0 %vm1341_vm0, %v1342_v17  ;;  %1003 = vmatprep.mubr.msk.f32.mxu1 %vm1341_vm0, %v1342_v17  ;;  %v1344_v0 = vmov 2475754826  }
  0x16   :  { %1148 = vmatpush3.bf16.msra.mxu0 %v1147_v4  ;;  %v1156_v14 = vpack.c.bf16 %v267_v13, %v266_v12  ;;  %v1159_v18 = vpack.c.bf16 %v269_v16, %v268_v15  ;;  %v270_v19 = vld [vmem:[#allocation2 + $0x50] sm:$0xff]  ;;  %v271_v20 = vld [vmem:[#allocation2 + $0x58] sm:$0xff]  ;;  %v272_v22 = vld [vmem:[#allocation2 + $0x60] sm:$0xff]  ;;  %v1345_v4 = vmov 2131351028  }
  0x17   :  { %1149 = vmatprep.subr.bf16.mxu0 %v1340_v5  ;;  %v1162_v21 = vpack.c.bf16 %v271_v20, %v270_v19  ;;  %v273_v23 = vld [vmem:[#allocation2 + $0x68] sm:$0xff]  ;;  %v274_v25 = vld [vmem:[#allocation2 + $0x70] sm:$0xff]  ;;  %v275_v26 = vld [vmem:[#allocation2 + $0x78] sm:$0xff] }
  0x18   :  { %v1165_v24 = vpack.c.bf16 %v273_v23, %v272_v22  ;;  %v1168_v27 = vpack.c.bf16 %v275_v26, %v274_v25  ;;  %v352_v28 = vld [vmem:[#allocation2 + $0x80] sm:$0xff]  ;;  %v353_v29 = vld [vmem:[#allocation2 + $0x88] sm:$0xff]  ;;  %v354_v30 = vld [vmem:[#allocation2 + $0x90] sm:$0xff] }
  0x19   :  { %v1171_v31 = vpack.c.bf16 %v353_v29, %v352_v28  ;;  %v355_v32 = vld [vmem:[#allocation2 + $0x98] sm:$0xff]  ;;  %v356_v34 = vld [vmem:[#allocation2 + $0xa0] sm:$0xff]  ;;  %v357_v35 = vld [vmem:[#allocation2 + $0xa8] sm:$0xff] }
  0x1a   :  { %1151 = vmatpush3.bf16.msra.mxu0 %v1150_v8  ;;  %v1174_v33 = vpack.c.bf16 %v355_v32, %v354_v30  ;;  %v1177_v36 = vpack.c.bf16 %v357_v35, %v356_v34  ;;  %v358_v37 = vld [vmem:[#allocation2 + $0xb0] sm:$0xff]  ;;  %v359_v38 = vld [vmem:[#allocation2 + $0xb8] sm:$0xff]  ;;  %v360_v40 = vld [vmem:[#allocation2 + $0xc0] sm:$0xff]  ;;  %v1346_v8 = vmov 2102212464  }
  0x1b   :  { %1152 = vmatprep.subr.bf16.mxu0 %v1340_v5  ;;  %1172 = vmatpush3.bf16.msra.mxu1 %v1171_v31  ;;  %v1180_v39 = vpack.c.bf16 %v359_v38, %v358_v37  ;;  %v361_v41 = vld [vmem:[#allocation2 + $0xc8] sm:$0xff]  ;;  %v362_v43 = vld [vmem:[#allocation2 + $0xd0] sm:$0xff]  ;;  %v363_v44 = vld [vmem:[#allocation2 + $0xd8] sm:$0xff] }
  0x1c   :  { %1173 = vmatprep.subr.bf16.mxu1 %v1340_v5  ;;  %v1183_v42 = vpack.c.bf16 %v361_v41, %v360_v40  ;;  %v1186_v45 = vpack.c.bf16 %v363_v44, %v362_v43  ;;  %v364_v46 = vld [vmem:[#allocation2 + $0xe0] sm:$0xff]  ;;  %v365_v47 = vld [vmem:[#allocation2 + $0xe8] sm:$0xff] }
  0x1d   :  { %v1189_v48 = vpack.c.bf16 %v365_v47, %v364_v46  ;;  %v817_v49 = vld [vmem:[#allocation2 + $0x306] ss:$0 sm:$0xff] }
  0x1e   :  { %1154 = vmatpush3.bf16.msra.mxu0 %v1153_v11  ;;  %v1347_v11 = vmov 920167782  }
  0x1f   :  { %1155 = vmatprep.subr.bf16.mxu0 %v1340_v5  ;;  %1175 = vmatpush3.bf16.msra.mxu1 %v1174_v33 }
  0x20   :  { %1176 = vmatprep.subr.bf16.mxu1 %v1340_v5 }
  0x22   :  { %1157 = vmatpush3.bf16.msra.mxu0 %v1156_v14  ;;  %v1348_v14 = vmov 1326507024  }
  0x23   :  { %1158 = vmatprep.subr.bf16.mxu0 %v1340_v5  ;;  %1178 = vmatpush3.bf16.msra.mxu1 %v1177_v36 }
  0x24   :  { %1179 = vmatprep.subr.bf16.mxu1 %v1340_v5 }
  0x26   :  { %1160 = vmatpush3.bf16.msra.mxu0 %v1159_v18 }
  0x27   :  { %1161 = vmatprep.subr.bf16.mxu0 %v1340_v5  ;;  %1181 = vmatpush3.bf16.msra.mxu1 %v1180_v39 }
  0x28   :  { %1182 = vmatprep.subr.bf16.mxu1 %v1340_v5 }
  0x2a   :  { %1163 = vmatpush3.bf16.msra.mxu0 %v1162_v21 }
  0x2b   :  { %1164 = vmatprep.subr.bf16.mxu0 %v1340_v5  ;;  %1184 = vmatpush3.bf16.msra.mxu1 %v1183_v42 }
  0x2c   :  { %1185 = vmatprep.subr.bf16.mxu1 %v1340_v5 }
  0x2e   :  { %1166 = vmatpush3.bf16.msra.mxu0 %v1165_v24 }
  0x2f   :  { %1167 = vmatprep.subr.bf16.mxu0 %v1340_v5  ;;  %1187 = vmatpush3.bf16.msra.mxu1 %v1186_v45 }
  0x30   :  { %1188 = vmatprep.subr.bf16.mxu1 %v1340_v5 }
  0x32   :  { %1169 = vmatpush3.bf16.msra.mxu0 %v1168_v27 }
  0x33   :  { %1194 = vmatprep.subr.bf16.mxu0 %v1340_v5  ;;  %1190 = vmatpush3.bf16.msra.mxu1 %v1189_v48 }
  0x34   :  { %1191 = vmatprep.subr.bf16.mxu1 %v1340_v5 }
  0x93   :  { %v32_v50 = vpop.permute.xlu0 %31 }
  0x94   :  { %v1403_v51 = vmul.f32 %v817_v49, %v32_v50 }
  0x96   :  { %v42_v52 = vand.u32 2139095040, %v1403_v51  ;;  %v39_v56 = vand.u32 2147483647, %v1403_v51  ;;  %vm41_vm8 = vcmp.lt.s32.totalorder %v1403_v51, 0 }
  0x98   :  { %v43_v53 = vshrl.u32 %v42_v52, 23  ;;  %v46_v59 = vand.u32 8388607, %v39_v56  ;;  %vm40_vm9 = vcmp.le.f32.partialorder %v39_v56, 0.7853982 }
  0x9a   :  { %v818_v54 = vadd.s32 4294967169, %v43_v53  ;;  %v47_v16 = vor.u32 8388608, %v46_v59 }
  0x9c   :  { %v49_v55 = vadd.s32 1, %v818_v54  ;;  %v87_v31 = vshll.u32 %v47_v16, 8 }
  0x9e   :  { %vm50_vm1 = vcmp.gt.s32.totalorder %v49_v55, 0 }
  0x9f   :  { %v51_v57 = vsel %vm50_vm1, %v49_v55, 0  ;;  %vm257_vm1 = vcmask 64512  }
  0xa0   :  { %v53_v58 = vand.u32 31, %v51_v57  ;;  %v52_v61 = vshrl.u32 %v51_v57, 5 }
  0xa2   :  { %v54_v60 = vsub.s32 32, %v53_v58  ;;  %v56_v63 = vshll.u32 %v1343_v62, %v53_v58  ;;  %v59_v2 = vshll.u32 %v1344_v0, %v53_v58  ;;  %v62_v7 = vshll.u32 %v1345_v4, %v53_v58 }
  0xa3   :  { %v65_v10 = vshll.u32 %v1346_v8, %v53_v58  ;;  %v68_v13 = vshll.u32 %v1347_v11, %v53_v58  ;;  %vm71_vm2 = vcmp.lt.s32.totalorder %v52_v61, 1  ;;  %vm74_vm3 = vcmp.lt.s32.totalorder %v52_v61, 4 }
  0xa4   :  { %v57_v3 = vshrl.u32 %v1344_v0, %v54_v60  ;;  %v60_v6 = vshrl.u32 %v1345_v4, %v54_v60  ;;  %v63_v9 = vshrl.u32 %v1346_v8, %v54_v60  ;;  %v66_v12 = vshrl.u32 %v1347_v11, %v54_v60 }
  0xa5   :  { %v69_v15 = vshrl.u32 %v1348_v14, %v54_v60  ;;  %v55_v26 = vshrl.u32 %v1343_v62, %v54_v60  ;;  %vm73_vm4 = vcmp.lt.s32.totalorder %v52_v61, 3  ;;  %vm72_vm5 = vcmp.lt.s32.totalorder %v52_v61, 2 }
  0xa6   :  { %v58_v18 = vor.u32 %v57_v3, %v56_v63  ;;  %v61_v19 = vor.u32 %v60_v6, %v59_v2  ;;  %v64_v20 = vor.u32 %v63_v9, %v62_v7  ;;  %v67_v21 = vor.u32 %v66_v12, %v65_v10 }
  0xa7   :  { %v70_v22 = vor.u32 %v69_v15, %v68_v13 }
  0xa8   :  { %v76_v23 = vsel %vm74_vm3, %v64_v20, 2102212464  ;;  %v79_v24 = vsel %vm71_vm2, %v58_v18, %v61_v19  ;;  %v83_v25 = vsel %vm71_vm2, %v61_v19, %v64_v20  ;;  %v80_v27 = vsel %vm74_vm3, %v67_v21, 920167782 }
  0xa9   :  { %v84_v28 = vsel %vm74_vm3, %v70_v22, 1326507024  ;;  %v81_v29 = vsel %vm73_vm4, %v64_v20, %v80_v27  ;;  %v75_v32 = vsel %vm71_vm2, %v55_v26, %v58_v18  ;;  %v77_v33 = vsel %vm73_vm4, %v61_v19, %v76_v23  ;;  %v827_v22 = vld [vmem:[#allocation2 + $0x308] ss:$0 sm:$0xff] }
  0xaa   :  { %v85_v30 = vsel %vm73_vm4, %v67_v21, %v84_v28  ;;  %v82_v34 = vsel %vm72_vm5, %v79_v24, %v81_v29  ;;  %v78_v40 = vsel %vm72_vm5, %v75_v32, %v77_v33  ;;  %v822_v21 = vld [vmem:[#allocation2 + $0x307] ss:$0 sm:$0xff]  ;;  %vm131_vm2 = vweird.f32 %v1403_v51 }
  0xab   :  { %v86_v35 = vsel %vm72_vm5, %v83_v25, %v85_v30  ;;  %v1412_v38 = vmul.u32.u64.low %v87_v31, %v82_v34  ;;  %v1413_v39 = vmul.u32.u64.high %v87_v31, %v82_v34, %v1412_v38  ;;  %v94_v42 = vmul.u32 %v87_v31, %v78_v40  ;;  %v366_v34 = vld [vmem:[#allocation2 + $0xf0] sm:$0xff]  ;;  %v447_v40 = vld [vmem:[#allocation2 + $0x118] sm:$0xff] }
  0xac   :  { %v1409_v36 = vmul.u32.u64.low %v87_v31, %v86_v35  ;;  %v1410_v37 = vmul.u32.u64.high %v87_v31, %v86_v35, %v1409_v36  ;;  %v258_v31 = vsel %vm257_vm1, %v1379_v1, 0.0  ;;  %v367_v35 = vld [vmem:[#allocation2 + $0xf8] sm:$0xff]  ;;  %v448_v1 = vld [vmem:[#allocation2 + $0x120] sm:$0xff] }
  0xad   :  { %v97_v41 = vadd.s32 1, %v1413_v39  ;;  %v1192_v36 = vpack.c.bf16 %v367_v35, %v366_v34  ;;  %v629_v34 = vld [vmem:[#allocation2 + $0x208] sm:$0xff]  ;;  %v630_v35 = vld [vmem:[#allocation2 + $0x210] sm:$0xff] }
  0xae   :  { %vm96_vm6 = vc.u32 %v1410_v37, %v1412_v38  ;;  %v95_v55 = vadd.s32 %v1412_v38, %v1410_v37  ;;  %v445_v37 = vld [vmem:[#allocation2 + $0x108] sm:$0xff]  ;;  %v446_v38 = vld [vmem:[#allocation2 + $0x110] sm:$0xff] }
  0xaf   :  { %v98_v43 = vsel %vm96_vm6, %v97_v41, %v1413_v39  ;;  %1193 = vmatpush3.bf16.msra.mxu1 %v1192_v36  ;;  %v1198_v41 = vpack.c.bf16 %v447_v40, %v446_v38  ;;  %v632_v38 = vld [vmem:[#allocation2 + $0x220] sm:$0xff] }
  0xb0   :  { %v99_v44 = vadd.s32 %v98_v43, %v94_v42  ;;  %1218 = vmatprep.subr.bf16.mxu1 %v1340_v5  ;;  %v449_v42 = vld [vmem:[#allocation2 + $0x128] sm:$0xff] }
  0xb1   :  { %v1201_v43 = vpack.c.bf16 %v449_v42, %v448_v1  ;;  %v635_v1 = vld [vmem:[#allocation2 + $0x238] sm:$0xff] }
  0xb2   :  { %v100_v45 = vadd.s32 536870912, %v99_v44 }
  0xb4   :  { %v101_v46 = vshrl.u32 %v100_v45, 30  ;;  %v451_v45 = vld [vmem:[#allocation2 + $0x138] sm:$0xff] }
  0xb6   :  { %v102_v47 = vshll.u32 %v101_v46, 30  ;;  %v125_v6 = vsub.s32 4, %v101_v46 }
  0xb8   :  { %v103_v48 = vsub.s32 %v99_v44, %v102_v47  ;;  %v126_v9 = vsel %vm41_vm8, %v125_v6, %v101_v46  ;;  %v450_v44 = vld [vmem:[#allocation2 + $0x130] sm:$0xff]  ;;  %v452_v47 = vld [vmem:[#allocation2 + $0x140] sm:$0xff] }
  0xb9   :  { %v128_v11 = vsel %vm40_vm9, 0, %v126_v9  ;;  %v1204_v46 = vpack.c.bf16 %v451_v45, %v450_v44  ;;  %v538_v6 = vld [vmem:[#allocation2 + $0x190] sm:$0xff]  ;;  %v637_v44 = vld [vmem:[#allocation2 + $0x248] sm:$0xff] }
  0xba   :  { %v105_v49 = vsub.s32 0, %v103_v48  ;;  %v132_v12 = vadd.s32 3, %v128_v11  ;;  %v241_v14 = vand.u32 3, %v128_v11  ;;  %v541_v11 = vld [vmem:[#allocation2 + $0x1a8] sm:$0xff] }
  0xbc   :  { %v819_v50 = vmin.u32 %v105_v49, %v103_v48  ;;  %v133_v13 = vand.u32 3, %v132_v12  ;;  %vm246_vm11 = vcmp.eq.s32.totalorder %v241_v14, 2  ;;  %vm243_vm13 = vcmp.eq.s32.totalorder %v241_v14, 0 }
  0xbd   :  { %vm242_vm15 = vcmp.lt.s32.totalorder %v241_v14, 2  ;;  %v543_v14 = vld [vmem:[#allocation2 + $0x1b8] sm:$0xff] }
  0xbe   :  { %v107_v52 = vclz %v819_v50  ;;  %vm138_vm10 = vcmp.eq.s32.totalorder %v133_v13, 2  ;;  %vm135_vm12 = vcmp.eq.s32.totalorder %v133_v13, 0  ;;  %vm134_vm14 = vcmp.lt.s32.totalorder %v133_v13, 2  ;;  %v454_v50 = vld [vmem:[#allocation2 + $0x150] sm:$0xff] }
  0xbf   :  { %v542_v13 = vld [vmem:[#allocation2 + $0x1b0] sm:$0xff] }
  0xc0   :  { %v820_v53 = vadd.s32 4294967294, %v107_v52  ;;  %v455_v52 = vld [vmem:[#allocation2 + $0x158] sm:$0xff] }
  0xc2   :  { %vm821_vm7 = vcmp.lt.s32.totalorder %v820_v53, 0 }
  0xc3   :  { %v110_v54 = vsel %vm821_vm7, 0, %v820_v53  ;;  %v1210_v53 = vpack.c.bf16 %v455_v52, %v454_v50  ;;  %v641_v50 = vld [vmem:[#allocation2 + $0x268] sm:$0xff] }
  0xc4   :  { %v111_v57 = vsub.s32 32, %v110_v54  ;;  %v115_v58 = vsub.s32 4294967266, %v110_v54  ;;  %v112_v59 = vshll.u32 %v103_v48, %v110_v54  ;;  %v453_v48 = vld [vmem:[#allocation2 + $0x148] sm:$0xff]  ;;  %v456_v54 = vld [vmem:[#allocation2 + $0x160] sm:$0xff] }
  0xc5   :  { %v1207_v49 = vpack.c.bf16 %v453_v48, %v452_v47  ;;  %v639_v47 = vld [vmem:[#allocation2 + $0x258] sm:$0xff] }
  0xc6   :  { %v113_v60 = vshrl.u32 %v95_v55, %v111_v57  ;;  %v116_v61 = vadd.s32 127, %v115_v58  ;;  %v457_v55 = vld [vmem:[#allocation2 + $0x168] sm:$0xff]  ;;  %v828_v58 = vld [vmem:[#allocation2 + $0x300] ss:$0 sm:$0xff] }
  0xc7   :  { %v1213_v57 = vpack.c.bf16 %v457_v55, %v456_v54 }
  0xc8   :  { %v114_v62 = vor.u32 %v113_v60, %v112_v59  ;;  %v117_v63 = vshll.u32 %v116_v61, 23 }
  0xca   :  { %v118_v0 = vor.u32 4788187, %v117_v63  ;;  %v121_v3 = vcvt.s32.f32 %v114_v62  ;;  %v458_v63 = vld [vmem:[#allocation2 + $0x170] sm:$0xff] }
  0xcc   :  { %v119_v2 = vand.u32 2147483647, %v118_v0  ;;  %v459_v0 = vld [vmem:[#allocation2 + $0x178] sm:$0xff] }
  0xce   :  { %v122_v4 = vmul.f32 %v121_v3, %v119_v2  ;;  %v1216_v2 = vpack.c.bf16 %v459_v0, %v458_v63  ;;  %v536_v3 = vld [vmem:[#allocation2 + $0x180] sm:$0xff]  ;;  %v721_v63 = vld [vmem:[#allocation2 + $0x288] sm:$0xff]  ;;  %v722_v0 = vld [vmem:[#allocation2 + $0x290] sm:$0xff] }
  0xd0   :  { %v123_v7 = vxor.u32 2147483648, %v122_v4 }
  0xd2   :  { %v124_v8 = vsel %vm41_vm8, %v123_v7, %v122_v4  ;;  %v537_v4 = vld [vmem:[#allocation2 + $0x188] sm:$0xff] }
  0xd3   :  { %v127_v10 = vsel %vm40_vm9, %v1403_v51, %v124_v8  ;;  %v444_v51 = vld [vmem:[#allocation2 + $0x100] sm:$0xff]  ;;  %v1219_v7 = vpack.c.bf16 %v537_v4, %v536_v3  ;;  %v539_v8 = vld [vmem:[#allocation2 + $0x198] sm:$0xff] }
  0xd4   :  { %1308 = vcosq.f32 %v127_v10  ;;  %v1195_v39 = vpack.c.bf16 %v445_v37, %v444_v51  ;;  %v1222_v9 = vpack.c.bf16 %v539_v8, %v538_v6  ;;  %v631_v51 = vld [vmem:[#allocation2 + $0x218] sm:$0xff]  ;;  %v724_v6 = vld [vmem:[#allocation2 + $0x2a0] sm:$0xff] }
  0xd5   :  { %1310 = vsinq.f32 %v127_v10  ;;  %v540_v10 = vld [vmem:[#allocation2 + $0x1a0] sm:$0xff]  ;;  %v1246_v37 = vpack.c.bf16 %v631_v51, %v630_v35  ;;  %v723_v3 = vld [vmem:[#allocation2 + $0x298] sm:$0xff] }
  0xd6   :  { %v1225_v12 = vpack.c.bf16 %v541_v11, %v540_v10  ;;  %v1270_v4 = vpack.c.bf16 %v723_v3, %v722_v0  ;;  %v728_v11 = vld [vmem:[#allocation2 + $0x2c0] sm:$0xff] }
  0xde   :  { %v1309_v15 = vpop.eup %1308 }
  0xdf   :  { %v1311_v16 = vpop.eup %1310  ;;  %v139_v18 = vxor.u32 2147483648, %v1309_v15 }
  0xe0   :  { %v136_v19 = vxor.u32 2147483648, %v1311_v16 }
  0xe1   :  { %v140_v20 = vsel %vm138_vm10, %v139_v18, %v1311_v16  ;;  %v248_v56 = vsel %vm246_vm11, %v139_v18, %v1311_v16  ;;  %v544_v16 = vld [vmem:[#allocation2 + $0x1c0] sm:$0xff]  ;;  %v545_v18 = vld [vmem:[#allocation2 + $0x1c8] sm:$0xff] }
  0xe2   :  { %v137_v23 = vsel %vm135_vm12, %v1309_v15, %v136_v19  ;;  %v245_v24 = vsel %vm243_vm13, %v1309_v15, %v136_v19  ;;  %v1228_v15 = vpack.c.bf16 %v543_v14, %v542_v13  ;;  %v1231_v19 = vpack.c.bf16 %v545_v18, %v544_v16  ;;  %v730_v14 = vld [vmem:[#allocation2 + $0x2d0] sm:$0xff]  ;;  %v732_v18 = vld [vmem:[#allocation2 + $0x2e0] sm:$0xff] }
  0xe3   :  { %v141_v25 = vsel %vm134_vm14, %v137_v23, %v140_v20  ;;  %v249_v26 = vsel %vm242_vm15, %v245_v24, %v248_v56  ;;  %v546_v20 = vld [vmem:[#allocation2 + $0x1d0] sm:$0xff]  ;;  %v547_v56 = vld [vmem:[#allocation2 + $0x1d8] sm:$0xff]  ;;  %v549_v23 = vld [vmem:[#allocation2 + $0x1e8] sm:$0xff] }
  0xe4   :  { %v142_v27 = vsel %vm131_vm2, nan, %v141_v25  ;;  %v250_v28 = vsel %vm131_vm2, nan, %v249_v26  ;;  %v829_v25 = vld [vmem:[#allocation2 + $0x301] ss:$0 sm:$0xff] }
  0xe5   :  { %v147_v29 = vmul.f32 %v822_v21, %v142_v27  ;;  %v255_v30 = vmul.f32 %v827_v22, %v250_v28  ;;  %v1234_v21 = vpack.c.bf16 %v547_v56, %v546_v20  ;;  %v548_v22 = vld [vmem:[#allocation2 + $0x1e0] sm:$0xff] }
  0xe6   :  { %v1237_v24 = vpack.c.bf16 %v549_v23, %v548_v22  ;;  %v831_v56 = vld [vmem:[#allocation2 + $0x303] ss:$0 sm:$0xff] }
  0xe7   :  { %v256_v32 = vadd.f32 %v255_v30, %v147_v29  ;;  %v550_v30 = vld [vmem:[#allocation2 + $0x1f0] sm:$0xff] }
  0xe9   :  { %v259_v33 = vadd.f32 %v258_v31, %v256_v32  ;;  %v551_v31 = vld [vmem:[#allocation2 + $0x1f8] sm:$0xff] }
  0xea   :  { %v1240_v32 = vpack.c.bf16 %v551_v31, %v550_v30 }
  0xeb   :  { %969 = vmatmul.mubr.f32.vlgmr.msra.gmra.mrb[0].mxu0 %v259_v33  ;;  %v628_v33 = vld [vmem:[#allocation2 + $0x200] sm:$0xff] }
  0xec   :  { %1038 = vmatprep.mubr.msk.f32.mxu0 %vm1341_vm0, %v1342_v17  ;;  %1196 = vmatpush3.bf16.msra.mxu0 %v1195_v39  ;;  %v1243_v36 = vpack.c.bf16 %v629_v34, %v628_v33  ;;  %v633_v39 = vld [vmem:[#allocation2 + $0x228] sm:$0xff]  ;;  %v833_v33 = vld [vmem:[#allocation2 + $0x305] ss:$0 sm:$0xff] }
  0xed   :  { %1197 = vmatprep.subr.bf16.mxu0 %v1340_v5  ;;  %v1249_v40 = vpack.c.bf16 %v633_v39, %v632_v38 }
  0xf0   :  { %1199 = vmatpush3.bf16.msra.mxu0 %v1198_v41  ;;  %v634_v41 = vld [vmem:[#allocation2 + $0x230] sm:$0xff] }
  0xf1   :  { %1200 = vmatprep.subr.bf16.mxu0 %v1340_v5  ;;  %v1252_v42 = vpack.c.bf16 %v635_v1, %v634_v41 }
  0xf4   :  { %1202 = vmatpush3.bf16.msra.mxu0 %v1201_v43  ;;  %v636_v43 = vld [vmem:[#allocation2 + $0x240] sm:$0xff] }
  0xf5   :  { %1203 = vmatprep.subr.bf16.mxu0 %v1340_v5  ;;  %v1255_v45 = vpack.c.bf16 %v637_v44, %v636_v43 }
  0xf8   :  { %1205 = vmatpush3.bf16.msra.mxu0 %v1204_v46  ;;  %v638_v46 = vld [vmem:[#allocation2 + $0x250] sm:$0xff] }
  0xf9   :  { %1206 = vmatprep.subr.bf16.mxu0 %v1340_v5  ;;  %v1258_v48 = vpack.c.bf16 %v639_v47, %v638_v46 }
  0xfc   :  { %1208 = vmatpush3.bf16.msra.mxu0 %v1207_v49  ;;  %v640_v49 = vld [vmem:[#allocation2 + $0x260] sm:$0xff] }
  0xfd   :  { %1209 = vmatprep.subr.bf16.mxu0 %v1340_v5  ;;  %v1261_v52 = vpack.c.bf16 %v641_v50, %v640_v49 }
 0x100   :  { %1211 = vmatpush3.bf16.msra.mxu0 %v1210_v53  ;;  %v830_v53 = vld [vmem:[#allocation2 + $0x302] ss:$0 sm:$0xff] }
 0x101   :  { %1212 = vmatprep.subr.bf16.mxu0 %v1340_v5 }
 0x104   :  { %1214 = vmatpush3.bf16.msra.mxu0 %v1213_v57 }
 0x105   :  { %1215 = vmatprep.subr.bf16.mxu0 %v1340_v5 }
 0x108   :  { %1217 = vmatpush3.bf16.msra.mxu0 %v1216_v2 }
 0x109   :  { %1242 = vmatprep.subr.bf16.mxu0 %v1340_v5 }
 0x1be   :  { %v347_v59 = vpop.f32.mrb[0].mxu0 }
 0x1bf   :  { %v348_v60 = vadd.f32 %v828_v58, %v347_v59  ;;  %v970_v61 = vpop.f32.mrb[1].mxu0  ;;  %v642_v59 = vld [vmem:[#allocation2 + $0x270] sm:$0xff] }
 0x1c1   :  { %v351_v62 = vmax.f32 %v348_v60, 0.0  ;;  %v643_v60 = vld [vmem:[#allocation2 + $0x278] sm:$0xff] }
 0x1c2   :  { %v1264_v61 = vpack.c.bf16 %v643_v60, %v642_v59 }
 0x1c3   :  { %1004 = vmatmul.mubr.f32.vlgmr.msra.gmra.mrb[0].mxu1 %v351_v62  ;;  %v720_v62 = vld [vmem:[#allocation2 + $0x280] sm:$0xff] }
 0x1c4   :  { %1073 = vmatprep.mubr.msk.f32.mxu1 %vm1341_vm0, %v1342_v17  ;;  %1220 = vmatpush3.bf16.msra.mxu1 %v1219_v7  ;;  %v1267_v2 = vpack.c.bf16 %v721_v63, %v720_v62  ;;  %v725_v7 = vld [vmem:[#allocation2 + $0x2a8] sm:$0xff] }
 0x1c5   :  { %1221 = vmatprep.subr.bf16.mxu1 %v1340_v5  ;;  %v1273_v8 = vpack.c.bf16 %v725_v7, %v724_v6 }
 0x1c8   :  { %1223 = vmatpush3.bf16.msra.mxu1 %v1222_v9  ;;  %v727_v9 = vld [vmem:[#allocation2 + $0x2b8] sm:$0xff] }
 0x1c9   :  { %1224 = vmatprep.subr.bf16.mxu1 %v1340_v5 }
 0x1cc   :  { %1226 = vmatpush3.bf16.msra.mxu1 %v1225_v12  ;;  %v729_v12 = vld [vmem:[#allocation2 + $0x2c8] sm:$0xff] }
 0x1cd   :  { %1227 = vmatprep.subr.bf16.mxu1 %v1340_v5  ;;  %v1279_v13 = vpack.c.bf16 %v729_v12, %v728_v11 }
 0x1d0   :  { %1229 = vmatpush3.bf16.msra.mxu1 %v1228_v15  ;;  %v731_v15 = vld [vmem:[#allocation2 + $0x2d8] sm:$0xff] }
 0x1d1   :  { %1230 = vmatprep.subr.bf16.mxu1 %v1340_v5  ;;  %v1282_v16 = vpack.c.bf16 %v731_v15, %v730_v14 }
 0x1d4   :  { %1232 = vmatpush3.bf16.msra.mxu1 %v1231_v19  ;;  %v733_v19 = vld [vmem:[#allocation2 + $0x2e8] sm:$0xff] }
 0x1d5   :  { %1233 = vmatprep.subr.bf16.mxu1 %v1340_v5  ;;  %v1285_v20 = vpack.c.bf16 %v733_v19, %v732_v18 }
 0x1d8   :  { %1235 = vmatpush3.bf16.msra.mxu1 %v1234_v21 }
 0x1d9   :  { %1236 = vmatprep.subr.bf16.mxu1 %v1340_v5 }
 0x1dc   :  { %1238 = vmatpush3.bf16.msra.mxu1 %v1237_v24 }
 0x1dd   :  { %1239 = vmatprep.subr.bf16.mxu1 %v1340_v5 }
 0x1e0   :  { %1241 = vmatpush3.bf16.msra.mxu1 %v1240_v32 }
 0x1e1   :  { %1266 = vmatprep.subr.bf16.mxu1 %v1340_v5 }
 0x296   :  { %v439_v26 = vpop.f32.mrb[0].mxu1 }
 0x297   :  { %v440_v27 = vadd.f32 %v829_v25, %v439_v26  ;;  %v1005_v28 = vpop.f32.mrb[1].mxu1  ;;  %v734_v25 = vld [vmem:[#allocation2 + $0x2f0] sm:$0xff]  ;;  %v735_v26 = vld [vmem:[#allocation2 + $0x2f8] sm:$0xff] }
 0x298   :  { %v832_v28 = vld [vmem:[#allocation2 + $0x304] ss:$0 sm:$0xff] }
 0x299   :  { %v443_v29 = vmax.f32 %v440_v27, 0.0  ;;  %v1288_v27 = vpack.c.bf16 %v735_v26, %v734_v25 }
 0x29b   :  { %1039 = vmatmul.mubr.f32.vlgmr.msra.gmra.mrb[2].mxu0 %v443_v29 }
 0x29c   :  { %1108 = vmatprep.mubr.msk.f32.mxu0 %vm1341_vm0, %v1342_v17  ;;  %1244 = vmatpush3.bf16.msra.mxu0 %v1243_v36 }
 0x29d   :  { %1245 = vmatprep.subr.bf16.mxu0 %v1340_v5 }
 0x2a0   :  { %1247 = vmatpush3.bf16.msra.mxu0 %v1246_v37 }
 0x2a1   :  { %1248 = vmatprep.subr.bf16.mxu0 %v1340_v5 }
 0x2a4   :  { %1250 = vmatpush3.bf16.msra.mxu0 %v1249_v40 }
 0x2a5   :  { %1251 = vmatprep.subr.bf16.mxu0 %v1340_v5 }
 0x2a8   :  { %1253 = vmatpush3.bf16.msra.mxu0 %v1252_v42 }
 0x2a9   :  { %1254 = vmatprep.subr.bf16.mxu0 %v1340_v5 }
 0x2ac   :  { %1256 = vmatpush3.bf16.msra.mxu0 %v1255_v45 }
 0x2ad   :  { %1257 = vmatprep.subr.bf16.mxu0 %v1340_v5 }
 0x2b0   :  { %1259 = vmatpush3.bf16.msra.mxu0 %v1258_v48 }
 0x2b1   :  { %1260 = vmatprep.subr.bf16.mxu0 %v1340_v5 }
 0x2b4   :  { %1262 = vmatpush3.bf16.msra.mxu0 %v1261_v52 }
 0x2b5   :  { %1263 = vmatprep.subr.bf16.mxu0 %v1340_v5 }
 0x2b8   :  { %1265 = vmatpush3.bf16.msra.mxu0 %v1264_v61 }
 0x36e   :  { %v531_v54 = vpop.f32.mrb[2].mxu0 }
 0x36f   :  { %v532_v55 = vadd.f32 %v830_v53, %v531_v54  ;;  %v1040_v57 = vpop.f32.mrb[3].mxu0 }
 0x371   :  { %v535_v58 = vmax.f32 %v532_v55, 0.0 }
 0x373   :  { %1074 = vmatmul.mubr.f32.vlgmr.msra.gmra.mrb[2].mxu1 %v535_v58 }
 0x374   :  { %1143 = vmatprep.mubr.msk.f32.mxu1 %vm1341_vm0, %v1342_v17  ;;  %1268 = vmatpush3.bf16.msra.mxu1 %v1267_v2  ;;  %v726_v17 = vld [vmem:[#allocation2 + $0x2b0] sm:$0xff] }
 0x375   :  { %1269 = vmatprep.subr.bf16.mxu1 %v1340_v5  ;;  %v1276_v10 = vpack.c.bf16 %v727_v9, %v726_v17 }
 0x378   :  { %1271 = vmatpush3.bf16.msra.mxu1 %v1270_v4 }
 0x379   :  { %1272 = vmatprep.subr.bf16.mxu1 %v1340_v5 }
 0x37c   :  { %1274 = vmatpush3.bf16.msra.mxu1 %v1273_v8 }
 0x37d   :  { %1275 = vmatprep.subr.bf16.mxu1 %v1340_v5 }
 0x380   :  { %1277 = vmatpush3.bf16.msra.mxu1 %v1276_v10 }
 0x381   :  { %1278 = vmatprep.subr.bf16.mxu1 %v1340_v5 }
 0x384   :  { %1280 = vmatpush3.bf16.msra.mxu1 %v1279_v13 }
 0x385   :  { %1281 = vmatprep.subr.bf16.mxu1 %v1340_v5 }
 0x388   :  { %1283 = vmatpush3.bf16.msra.mxu1 %v1282_v16 }
 0x389   :  { %1284 = vmatprep.subr.bf16.mxu1 %v1340_v5 }
 0x38c   :  { %1286 = vmatpush3.bf16.msra.mxu1 %v1285_v20 }
 0x38d   :  { %1287 = vmatprep.subr.bf16.mxu1 %v1340_v5 }
 0x390   :  { %1289 = vmatpush3.bf16.msra.mxu1 %v1288_v27 }
 0x446   :  { %v623_v21 = vpop.f32.mrb[2].mxu1 }
 0x447   :  { %v624_v22 = vadd.f32 %v831_v56, %v623_v21  ;;  %v1075_v23 = vpop.f32.mrb[3].mxu1 }
 0x449   :  { %v627_v24 = vmax.f32 %v624_v22, 0.0 }
 0x44b   :  { %1109 = vmatmul.mubr.f32.vlgmr.msra.gmra.mrb[4].mxu0 %v627_v24 }
 0x51e   :  { %v715_v29 = vpop.f32.mrb[4].mxu0 }
 0x51f   :  { %v716_v30 = vadd.f32 %v832_v28, %v715_v29  ;;  %v1110_v31 = vpop.f32.mrb[5].mxu0 }
 0x521   :  { %v719_v32 = vmax.f32 %v716_v30, 0.0 }
 0x523   :  { %1144 = vmatmul.mubr.f32.vlgmr.msra.gmra.mrb[4].mxu1 %v719_v32 }
 0x5f6   :  { %v807_v34 = vpop.f32.mrb[4].mxu1 }
 0x5f7   :  { %v808_v35 = vadd.f32 %v833_v33, %v807_v34  ;;  %v1145_v5 = vpop.f32.mrb[5].mxu1 }
 0x5f9   :  { %811 = vst [vmem:[%s1469_s2] sm:$0xff] %v808_v35 }
 0x5fa   :  { %816 = vsyncpa [#allocation3], 1 }

</bundles_post_ra>
